<compile_context>
chip_gen: v7x
topology: tpu7x:2x2x1
jax: 0.10.0
libtpu: 0.0.40
codegen_flags: <defaults>
</compile_context>

<pallas_src>
import functools

import numpy as np
import jax
import jax.numpy as jnp
from jax.experimental import pallas as pl
from jax.experimental.pallas import tpu as pltpu


def _hardswish(x):
    # y * clip(y/6 + 0.5, 0, 1) == y * clip(y + 3, 0, 6) / 6  (1/6 folded)
    return x * jnp.clip(x * (1.0 / 6.0) + 0.5, 0.0, 1.0)


def _sigmoid(x):
    # pl.reciprocal keeps the divide off the VALU critical path; approx=False
    # (exact) because the attention tensors are ~TV/S (~8x) smaller than the
    # main elementwise pass, so the extra Newton step is free and keeps f32
    # parity with the reference.
    return pl.reciprocal(1.0 + jnp.exp(-x), approx=False)


def stc_att3_kernel(x_ref, a_ref, et_ref, ev_ref, w1_ref, b1_ref,
                    w2_ref, b2_ref, s2_ref, h2_ref, o_ref, *, nb, C, T, V):
    TV = T * V
    S = T + V + 1
    Ci = w1_ref.shape[0]
    f32 = jnp.float32

    x = x_ref[...].astype(f32)                       # (nb, C, TV); math in f32
    x2 = x.reshape(nb * C, TV)                       # free reshape (C % 8 == 0)

    # ---- pooled descriptors (mean over V | mean over T | global mean) ----
    # One MXU pass on the lane-dense layout instead of XLU reductions.
    p = jnp.dot(x2, a_ref[...], preferred_element_type=f32)        # (nb*C, S)
    p3 = p.reshape(nb, C, S)

    # ---- fcn: Conv1x1(C->Ci) with BN folded, then Hardswish ----
    # NOTE(perf review): the explicitly-broadcast weight + batched einsum is
    # kept on purpose: the pure 2-D "(Ci,C)@(C,nb*S)" form needs a
    # (nb,C,S)->(C,nb*S) relayout whose Mosaic lowering is not guaranteed, and
    # this pooled path is only ~S/TV (~1/8) of the main elementwise pass, so
    # it is never the saturating slot even as nb grows.
    w1b = jnp.broadcast_to(w1_ref[...][None], (nb, Ci, C))
    h = jnp.einsum('nic,ncs->nis', w1b, p3, preferred_element_type=f32)
    h = _hardswish(h + b1_ref[...][None])            # (nb, Ci, S)

    # ---- conv_t / conv_v / conv_c fused into one stacked matmul ----
    w2b = jnp.broadcast_to(w2_ref[...][None], (nb, 3 * C, Ci))
    g = jnp.einsum('noi,nis->nos', w2b, h, preferred_element_type=f32)
    g = g + b2_ref[...][None]                        # (nb, 3C, S)
    att_t = _sigmoid(g[:, 0:C, 0:T])                 # (nb, C, T)
    att_v = _sigmoid(g[:, C:2 * C, T:T + V])         # (nb, C, V)
    att_c = _sigmoid(g[:, 2 * C:3 * C, S - 1:S])     # (nb, C, 1)
    att_c = att_c * s2_ref[...][None]                # fold output-BN scale here

    # ---- broadcast attention to lane-dense (nb*C, TV) via tiny MXU dots ----
    att = (jnp.dot(att_t.reshape(nb * C, T), et_ref[...],
                   preferred_element_type=f32)
           * jnp.dot(att_v.reshape(nb * C, V), ev_ref[...],
                     preferred_element_type=f32)
           * att_c.reshape(nb * C, 1))

    # ---- single full-tensor VPU pass: att*x (BN scale already in att) + shift
    # h2 is pre-broadcast to (C, TV) host-side -> plain vadd, no lane-broadcast.
    y = (att * x2).reshape(nb, C, TV) + h2_ref[...][None]
    o_ref[...] = _hardswish(y).astype(o_ref.dtype)


def _tpu_vmem_bytes():
    """Physical VMEM of the attached TPU; conservative (v7x-sized) fallback."""
    try:
        return int(pltpu.get_tpu_info().vmem_capacity_bytes)
    except Exception:
        return 64 << 20


def _pick_block_n(N, per_batch_bytes, x_bytes_per_batch, budget_bytes,
                  min_block_bytes=2 << 20, target_steps=4):
    """Batch elements per grid step.

    Take the biggest block the VMEM budget allows (per-step overhead ~0.35us,
    bigger blocks -> closer to the HBM roofline).  Only split further -- to
    give >= `target_steps` steps so v7x's two TensorCores each get >= 2
    pipelined iterations -- when the per-step x block stays above the measured
    ~2 MiB roofline plateau; on single-TC v5e/v6e the extra steps are then
    essentially free, and small-N cases take the whole batch in one step.
    """
    cap = max(1, int(budget_bytes) // max(int(per_batch_bytes), 1))
    nb = min(N, cap)
    if N >= target_steps:
        nb_split = pl.cdiv(N, target_steps)
        if nb_split * x_bytes_per_batch >= min_block_bytes:
            nb = min(nb, nb_split)
    return max(int(nb), 1)


def stc_att3(x, w1, b1, g1, be1, rm1, rv1, wt, bt, wv, bv, wc, bc,
             g2, be2, rm2, rv2, eps=1e-5, io_dtype=jnp.float32):
    N, C, T, V = x.shape
    Ci = w1.shape[0]
    TV = T * V
    S = T + V + 1
    f32 = jnp.float32

    # --- fold BN1 (inference) into the 1x1 conv: y = (s1*W)x + s1*(b-rm)+be ---
    s1 = g1 / jnp.sqrt(rv1 + eps)
    w1p = (w1 * s1[:, None]).astype(f32)                       # (Ci, C)
    b1p = (s1 * (b1 - rm1) + be1).reshape(Ci, 1).astype(f32)   # (Ci, 1)

    # --- stack conv_t / conv_v / conv_c into one weight / bias ---
    w2s = jnp.concatenate([wt, wv, wc], axis=0).astype(f32)             # (3C, Ci)
    b2s = jnp.concatenate([bt, bv, bc], axis=0).reshape(3 * C, 1).astype(f32)

    # --- output BN (inference): scale folded into attention inside kernel,
    #     shift pre-broadcast to a lane-dense (C, TV) constant (built once) ---
    s2 = (g2 / jnp.sqrt(rv2 + eps)).reshape(C, 1).astype(f32)
    h2 = (be2 - rm2 * g2 / jnp.sqrt(rv2 + eps)).astype(f32)
    h2full = jnp.broadcast_to(h2.reshape(C, 1), (C, TV))

    # --- constant matrices: pooling (means) and broadcast-back, run on MXU ---
    a_np = np.zeros((TV, S), np.float32)
    for t in range(T):
        a_np[t * V:(t + 1) * V, t] = 1.0 / V          # mean over V  -> col t
    for v in range(V):
        a_np[v::V, T + v] = 1.0 / T                   # mean over T  -> col T+v
    a_np[:, T + V] = 1.0 / TV                         # global mean  -> last col
    et_np = np.zeros((T, TV), np.float32)
    for t in range(T):
        et_np[t, t * V:(t + 1) * V] = 1.0             # repeat along V
    ev_np = np.zeros((V, TV), np.float32)
    for v in range(V):
        ev_np[v, v::V] = 1.0                          # tile along T
    a_mat, et_mat, ev_mat = map(jnp.asarray, (a_np, et_np, ev_np))

    # --- lane-dense I/O view; optional bf16 I/O halves HBM traffic ---
    x2 = x.reshape(N, C, TV).astype(io_dtype)
    io_item = np.dtype(io_dtype).itemsize

    # --- block sizing: x+out double-buffered + ~5 full-size f32 intermediates
    #     inside the body (x_f32, att, two broadcast products, y) ---
    x_bytes_per_batch = C * TV * io_item
    per_batch = 4 * x_bytes_per_batch + 5 * C * TV * 4
    vmem_cap = _tpu_vmem_bytes()
    data_budget = max(min(vmem_cap // 3, 44 << 20), 12 << 20)
    nb = _pick_block_n(N, per_batch, x_bytes_per_batch, data_budget)
    n_steps = pl.cdiv(N, nb)
    Npad = n_steps * nb
    if Npad != N:      # awkward batch sizes: pad instead of collapsing to nb=1
        x2 = jnp.pad(x2, ((0, Npad - N), (0, 0), (0, 0)))

    const_bytes = (TV * S + (T + V) * TV + Ci * (C + 1)
                   + 3 * C * (Ci + 1) + C * (TV + 1)) * 4
    limit_hi = max(min(2 * vmem_cap // 3, 64 << 20), 20 << 20)
    vmem_limit = int(np.clip(nb * per_batch + 2 * const_bytes + (4 << 20),
                             16 << 20, limit_hi))

    def const_spec(shape):
        return pl.BlockSpec(shape, lambda n, _nd=len(shape): (0,) * _nd)
    # NOTE: the 9 constants total <~0.2 MiB (~0.4 MiB double-buffered); single
    # buffering them (pipeline_mode=pl.Buffered(1)) would free that but is not
    # worth the lowering risk here.  Likewise pl.Buffered(3) on x is a cheap
    # sweep if xprof shows exposed DMA on v6e.

    grid_spec = pltpu.PrefetchScalarGridSpec(
        num_scalar_prefetch=0,
        grid=(n_steps,),
        in_specs=[
            pl.BlockSpec((nb, C, TV), lambda n: (n, 0, 0)),   # x (lane-dense)
            const_spec((TV, S)),          # pooling matrix
            const_spec((T, TV)),          # broadcast-over-V matrix
            const_spec((V, TV)),          # broadcast-over-T matrix
            const_spec((Ci, C)),          # folded fcn weight
            const_spec((Ci, 1)),          # folded fcn bias
            const_spec((3 * C, Ci)),      # stacked conv_t/v/c weight
            const_spec((3 * C, 1)),       # stacked conv_t/v/c bias
            const_spec((C, 1)),           # output-BN scale
            const_spec((C, TV)),          # output-BN shift (pre-broadcast)
        ],
        out_specs=pl.BlockSpec((nb, C, TV), lambda n: (n, 0, 0)),
    )

    kernel = functools.partial(stc_att3_kernel, nb=nb, C=C, T=T, V=V)

    out2 = pl.pallas_call(
        kernel,
        out_shape=jax.ShapeDtypeStruct((Npad, C, TV), io_dtype),
        grid_spec=grid_spec,
        compiler_params=pltpu.CompilerParams(
            dimension_semantics=("parallel",),
            vmem_limit_bytes=vmem_limit,
        ),
    )(x2, a_mat, et_mat, ev_mat, w1p, b1p, w2s, b2s, s2, h2full)

    return out2[:N].reshape(N, C, T, V)


def reference(x, w1, b1, g1, be1, rm1, rv1, wt, bt, wv, bv, wc, bc,
              g2, be2, rm2, rv2, eps=1e-5):
    """Plain-JAX replica of STC_Att3.forward (inference-mode BatchNorm)."""
    N, C, T, V = x.shape

    def bn(y, g, be, rm, rv):
        s = g / jnp.sqrt(rv + eps)
        return y * s.reshape(1, -1, 1, 1) + (be - rm * s).reshape(1, -1, 1, 1)

    def conv1x1(y, w, b):
        return jnp.einsum('oc,nchw->nohw', w, y) + b.reshape(1, -1, 1, 1)

    def hswish(y):
        return y * jnp.clip(y + 3.0, 0.0, 6.0) / 6.0

    def sig(y):
        return 1.0 / (1.0 + jnp.exp(-y))

    xt = x.mean(axis=3, keepdims=True)                           # (N,C,T,1)
    xv = jnp.swapaxes(x.mean(axis=2, keepdims=True), 2, 3)       # (N,C,V,1)
    xc = xt.mean(axis=2, keepdims=True)                          # (N,C,1,1)
    cat = jnp.concatenate([xt, xv, xc], axis=2)                  # (N,C,T+V+1,1)
    y = hswish(bn(conv1x1(cat, w1, b1), g1, be1, rm1, rv1))
    yt, yv, yc = y[:, :, :T], y[:, :, T:T + V], y[:, :, T + V:]
    at = sig(conv1x1(yt, wt, bt))                                # (N,C,T,1)
    av = sig(conv1x1(jnp.swapaxes(yv, 2, 3), wv, bv))            # (N,C,1,V)
    ac = sig(conv1x1(yc, wc, bc))                                # (N,C,1,1)
    out = at * av * ac * x
    out = bn(out, g2, be2, rm2, rv2)
    return hswish(out)


if __name__ == "__main__":
    N, C, T, V = 2, 16, 16, 16
    reduct_ratio = 4
    Ci = C // reduct_ratio
    eps = 1e-5

    ks = jax.random.split(jax.random.PRNGKey(0), 20)
    x = jax.random.normal(ks[0], (N, C, T, V), jnp.float32)

    # fcn: Conv2d(C, Ci, 1, bias=True) + BatchNorm2d(Ci)
    w1 = 0.2 * jax.random.normal(ks[1], (Ci, C), jnp.float32)
    b1 = 0.1 * jax.random.normal(ks[2], (Ci,), jnp.float32)
    g1 = 1.0 + 0.1 * jax.random.normal(ks[3], (Ci,), jnp.float32)
    be1 = 0.1 * jax.random.normal(ks[4], (Ci,), jnp.float32)
    rm1 = 0.1 * jax.random.normal(ks[5], (Ci,), jnp.float32)
    rv1 = 0.5 + jax.random.uniform(ks[6], (Ci,), jnp.float32)

    # conv_t / conv_v / conv_c: Conv2d(Ci, C, 1, bias=True)
    wt = 0.2 * jax.random.normal(ks[7], (C, Ci), jnp.float32)
    bt = 0.1 * jax.random.normal(ks[8], (C,), jnp.float32)
    wv = 0.2 * jax.random.normal(ks[9], (C, Ci), jnp.float32)
    bv = 0.1 * jax.random.normal(ks[10], (C,), jnp.float32)
    wc = 0.2 * jax.random.normal(ks[11], (C, Ci), jnp.float32)
    bc = 0.1 * jax.random.normal(ks[12], (C,), jnp.float32)

    # add_attention: BatchNorm2d(C)
    g2 = 1.0 + 0.1 * jax.random.normal(ks[13], (C,), jnp.float32)
    be2 = 0.1 * jax.random.normal(ks[14], (C,), jnp.float32)
    rm2 = 0.1 * jax.random.normal(ks[15], (C,), jnp.float32)
    rv2 = 0.5 + jax.random.uniform(ks[16], (C,), jnp.float32)

    params = (w1, b1, g1, be1, rm1, rv1, wt, bt, wv, bv, wc, bc,
              g2, be2, rm2, rv2)

    ref = reference(x, *params, eps=eps)

    # --- f32 I/O path: tight parity with the reference ---
    out = stc_att3(x, *params, eps=eps, io_dtype=jnp.float32)
    out = jax.block_until_ready(out)
    assert out.shape == (N, C, T, V)
    assert bool(jnp.allclose(out, ref, atol=2e-3, rtol=2e-3)), "f32 mismatch vs reference"

    # --- bf16 I/O path (halves HBM traffic on this bandwidth-bound kernel);
    #     compare against the reference fed the same bf16-rounded input, with a
    #     bf16-level tolerance (output rounding only -- math stays f32). ---
    out_bf16 = stc_att3(x, *params, eps=eps, io_dtype=jnp.bfloat16)
    out_bf16 = jax.block_until_ready(out_bf16)
    x_bf = x.astype(jnp.bfloat16).astype(jnp.float32)
    ref_bf = reference(x_bf, *params, eps=eps)
    assert bool(jnp.allclose(out_bf16.astype(jnp.float32), ref_bf,
                             atol=3e-2, rtol=3e-2)), "bf16 mismatch vs reference"

    print("KERNEL_OK")
</pallas_src>

<mosaic_0001>
module attributes {stable_mosaic.version = 11 : i64} {
  func.func @stc_att3_kernel(%arg0: i32, %arg1: memref<2x16x256xf32, #tpu.memory_space<vmem>>, %arg2: memref<256x33xf32, #tpu.memory_space<vmem>>, %arg3: memref<16x256xf32, #tpu.memory_space<vmem>>, %arg4: memref<16x256xf32, #tpu.memory_space<vmem>>, %arg5: memref<4x16xf32, #tpu.memory_space<vmem>>, %arg6: memref<4x1xf32, #tpu.memory_space<vmem>>, %arg7: memref<48x4xf32, #tpu.memory_space<vmem>>, %arg8: memref<48x1xf32, #tpu.memory_space<vmem>>, %arg9: memref<16x1xf32, #tpu.memory_space<vmem>>, %arg10: memref<16x256xf32, #tpu.memory_space<vmem>>, %arg11: memref<2x16x256xf32, #tpu.memory_space<vmem>>) attributes {dimension_semantics = [#tpu.dimension_semantics<parallel>], iteration_bounds = array<i64: 1>, scalar_prefetch = 0 : i64, scratch_operands = 0 : i64, tpu.core_type = #tpu.core_type<tc>, window_params = [{transform_indices = @transform_0, window_bounds = array<i64: 2, 16, 256>}, {pipeline_mode = #tpu.pipeline_mode<synchronous>, transform_indices = @transform_1, window_bounds = array<i64: 256, 33>}, {pipeline_mode = #tpu.pipeline_mode<synchronous>, transform_indices = @transform_2, window_bounds = array<i64: 16, 256>}, {pipeline_mode = #tpu.pipeline_mode<synchronous>, transform_indices = @transform_3, window_bounds = array<i64: 16, 256>}, {pipeline_mode = #tpu.pipeline_mode<synchronous>, transform_indices = @transform_4, window_bounds = array<i64: 4, 16>}, {pipeline_mode = #tpu.pipeline_mode<synchronous>, transform_indices = @transform_5, window_bounds = array<i64: 4, 1>}, {pipeline_mode = #tpu.pipeline_mode<synchronous>, transform_indices = @transform_6, window_bounds = array<i64: 48, 4>}, {pipeline_mode = #tpu.pipeline_mode<synchronous>, transform_indices = @transform_7, window_bounds = array<i64: 48, 1>}, {pipeline_mode = #tpu.pipeline_mode<synchronous>, transform_indices = @transform_8, window_bounds = array<i64: 16, 1>}, {pipeline_mode = #tpu.pipeline_mode<synchronous>, transform_indices = @transform_9, window_bounds = array<i64: 16, 256>}, {transform_indices = @transform_10, window_bounds = array<i64: 2, 16, 256>}]} {
    %c0 = arith.constant 0 : index
    %c0_0 = arith.constant 0 : index
    %c0_1 = arith.constant 0 : index
    %0 = vector.load %arg1[%c0, %c0_0, %c0_1] : memref<2x16x256xf32, #tpu.memory_space<vmem>>, vector<2x16x256xf32>
    %1 = vector.shape_cast %0 : vector<2x16x256xf32> to vector<32x256xf32>
    %c0_2 = arith.constant 0 : index
    %c0_3 = arith.constant 0 : index
    %2 = vector.load %arg2[%c0_2, %c0_3] : memref<256x33xf32, #tpu.memory_space<vmem>>, vector<256x33xf32>
    %cst = arith.constant dense<0.000000e+00> : vector<32x33xf32>
    %3 = tpu.matmul %1, %2, %cst {dimension_numbers = #tpu.dot_dimension_numbers<[1], [0], [0], [1], [0, 0, 1, 1], [], []>} : vector<32x256xf32>, vector<256x33xf32>, vector<32x33xf32> -> vector<32x33xf32>
    %4 = vector.shape_cast %3 : vector<32x33xf32> to vector<2x16x33xf32>
    %c0_4 = arith.constant 0 : index
    %c0_5 = arith.constant 0 : index
    %5 = vector.load %arg5[%c0_4, %c0_5] : memref<4x16xf32, #tpu.memory_space<vmem>>, vector<4x16xf32>
    %6 = vector.shape_cast %5 : vector<4x16xf32> to vector<1x4x16xf32>
    %7 = vector.shape_cast %6 : vector<1x4x16xf32> to vector<1x4x16xf32>
    %8 = vector.broadcast %7 : vector<1x4x16xf32> to vector<2x4x16xf32>
    "tpu.trace_start"() <{level = 10 : i32, message = "nic,ncs->nis"}> : () -> ()
    %cst_6 = arith.constant dense<0.000000e+00> : vector<2x4x33xf32>
    %9 = tpu.matmul %8, %4, %cst_6 {dimension_numbers = #tpu.dot_dimension_numbers<[2], [1], [1], [2], [0, 0, 0, 1, 1, 2], [0], [0]>} : vector<2x4x16xf32>, vector<2x16x33xf32>, vector<2x4x33xf32> -> vector<2x4x33xf32>
    "tpu.trace_stop"() : () -> ()
    %c0_7 = arith.constant 0 : index
    %c0_8 = arith.constant 0 : index
    %10 = vector.load %arg6[%c0_7, %c0_8] : memref<4x1xf32, #tpu.memory_space<vmem>>, vector<4x1xf32>
    %11 = vector.shape_cast %10 : vector<4x1xf32> to vector<1x4x1xf32>
    %12 = vector.broadcast %11 : vector<1x4x1xf32> to vector<2x4x33xf32>
    %13 = arith.addf %9, %12 : vector<2x4x33xf32>
    %cst_9 = arith.constant 0.166666672 : f32
    %14 = vector.broadcast %cst_9 : f32 to vector<2x4x33xf32>
    %15 = arith.mulf %13, %14 : vector<2x4x33xf32>
    %cst_10 = arith.constant 5.000000e-01 : f32
    %16 = vector.broadcast %cst_10 : f32 to vector<2x4x33xf32>
    %17 = arith.addf %15, %16 : vector<2x4x33xf32>
    %cst_11 = arith.constant 0.000000e+00 : f32
    %cst_12 = arith.constant 1.000000e+00 : f32
    %18 = vector.broadcast %cst_11 : f32 to vector<2x4x33xf32>
    %19 = arith.maximumf %18, %17 : vector<2x4x33xf32>
    %20 = vector.broadcast %cst_12 : f32 to vector<2x4x33xf32>
    %21 = arith.minimumf %20, %19 : vector<2x4x33xf32>
    %22 = arith.mulf %13, %21 : vector<2x4x33xf32>
    %c0_13 = arith.constant 0 : index
    %c0_14 = arith.constant 0 : index
    %23 = vector.load %arg7[%c0_13, %c0_14] : memref<48x4xf32, #tpu.memory_space<vmem>>, vector<48x4xf32>
    %24 = vector.shape_cast %23 : vector<48x4xf32> to vector<1x48x4xf32>
    %25 = vector.shape_cast %24 : vector<1x48x4xf32> to vector<1x48x4xf32>
    %26 = vector.broadcast %25 : vector<1x48x4xf32> to vector<2x48x4xf32>
    "tpu.trace_start"() <{level = 10 : i32, message = "noi,nis->nos"}> : () -> ()
    %cst_15 = arith.constant dense<0.000000e+00> : vector<2x48x33xf32>
    %27 = tpu.matmul %26, %22, %cst_15 {dimension_numbers = #tpu.dot_dimension_numbers<[2], [1], [1], [2], [0, 0, 0, 1, 1, 2], [0], [0]>} : vector<2x48x4xf32>, vector<2x4x33xf32>, vector<2x48x33xf32> -> vector<2x48x33xf32>
    "tpu.trace_stop"() : () -> ()
    %c0_16 = arith.constant 0 : index
    %c0_17 = arith.constant 0 : index
    %28 = vector.load %arg8[%c0_16, %c0_17] : memref<48x1xf32, #tpu.memory_space<vmem>>, vector<48x1xf32>
    %29 = vector.shape_cast %28 : vector<48x1xf32> to vector<1x48x1xf32>
    %30 = vector.broadcast %29 : vector<1x48x1xf32> to vector<2x48x33xf32>
    %31 = arith.addf %27, %30 : vector<2x48x33xf32>
    %32 = vector.extract_strided_slice %31 {offsets = [0, 0, 0], sizes = [2, 16, 16], strides = [1, 1, 1]} : vector<2x48x33xf32> to vector<2x16x16xf32>
    %cst_18 = arith.constant 0.000000e+00 : f32
    %33 = vector.broadcast %cst_18 : f32 to vector<2x16x16xf32>
    %34 = arith.subf %33, %32 : vector<2x16x16xf32>
    %35 = math.exp %34 : vector<2x16x16xf32>
    %cst_19 = arith.constant 1.000000e+00 : f32
    %36 = vector.broadcast %cst_19 : f32 to vector<2x16x16xf32>
    %37 = arith.addf %36, %35 : vector<2x16x16xf32>
    %38 = tpu.reciprocal %37 : vector<2x16x16xf32> -> vector<2x16x16xf32>
    %39 = vector.extract_strided_slice %31 {offsets = [0, 16, 16], sizes = [2, 16, 16], strides = [1, 1, 1]} : vector<2x48x33xf32> to vector<2x16x16xf32>
    %cst_20 = arith.constant 0.000000e+00 : f32
    %40 = vector.broadcast %cst_20 : f32 to vector<2x16x16xf32>
    %41 = arith.subf %40, %39 : vector<2x16x16xf32>
    %42 = math.exp %41 : vector<2x16x16xf32>
    %cst_21 = arith.constant 1.000000e+00 : f32
    %43 = vector.broadcast %cst_21 : f32 to vector<2x16x16xf32>
    %44 = arith.addf %43, %42 : vector<2x16x16xf32>
    %45 = tpu.reciprocal %44 : vector<2x16x16xf32> -> vector<2x16x16xf32>
    %46 = vector.extract_strided_slice %31 {offsets = [0, 32, 32], sizes = [2, 16, 1], strides = [1, 1, 1]} : vector<2x48x33xf32> to vector<2x16x1xf32>
    %cst_22 = arith.constant 0.000000e+00 : f32
    %47 = vector.broadcast %cst_22 : f32 to vector<2x16x1xf32>
    %48 = arith.subf %47, %46 : vector<2x16x1xf32>
    %49 = math.exp %48 : vector<2x16x1xf32>
    %cst_23 = arith.constant 1.000000e+00 : f32
    %50 = vector.broadcast %cst_23 : f32 to vector<2x16x1xf32>
    %51 = arith.addf %50, %49 : vector<2x16x1xf32>
    %52 = tpu.reciprocal %51 : vector<2x16x1xf32> -> vector<2x16x1xf32>
    %c0_24 = arith.constant 0 : index
    %c0_25 = arith.constant 0 : index
    %53 = vector.load %arg9[%c0_24, %c0_25] : memref<16x1xf32, #tpu.memory_space<vmem>>, vector<16x1xf32>
    %54 = vector.shape_cast %53 : vector<16x1xf32> to vector<1x16x1xf32>
    %55 = vector.broadcast %54 : vector<1x16x1xf32> to vector<2x16x1xf32>
    %56 = arith.mulf %52, %55 : vector<2x16x1xf32>
    %57 = vector.shape_cast %38 : vector<2x16x16xf32> to vector<32x16xf32>
    %c0_26 = arith.constant 0 : index
    %c0_27 = arith.constant 0 : index
    %58 = vector.load %arg3[%c0_26, %c0_27] : memref<16x256xf32, #tpu.memory_space<vmem>>, vector<16x256xf32>
    %cst_28 = arith.constant dense<0.000000e+00> : vector<32x256xf32>
    %59 = tpu.matmul %57, %58, %cst_28 {dimension_numbers = #tpu.dot_dimension_numbers<[1], [0], [0], [1], [0, 0, 1, 1], [], []>} : vector<32x16xf32>, vector<16x256xf32>, vector<32x256xf32> -> vector<32x256xf32>
    %60 = vector.shape_cast %45 : vector<2x16x16xf32> to vector<32x16xf32>
    %c0_29 = arith.constant 0 : index
    %c0_30 = arith.constant 0 : index
    %61 = vector.load %arg4[%c0_29, %c0_30] : memref<16x256xf32, #tpu.memory_space<vmem>>, vector<16x256xf32>
    %cst_31 = arith.constant dense<0.000000e+00> : vector<32x256xf32>
    %62 = tpu.matmul %60, %61, %cst_31 {dimension_numbers = #tpu.dot_dimension_numbers<[1], [0], [0], [1], [0, 0, 1, 1], [], []>} : vector<32x16xf32>, vector<16x256xf32>, vector<32x256xf32> -> vector<32x256xf32>
    %63 = arith.mulf %59, %62 : vector<32x256xf32>
    %64 = vector.shape_cast %56 : vector<2x16x1xf32> to vector<32x1xf32>
    %65 = vector.broadcast %64 : vector<32x1xf32> to vector<32x256xf32>
    %66 = arith.mulf %63, %65 : vector<32x256xf32>
    %67 = arith.mulf %66, %1 : vector<32x256xf32>
    %68 = vector.shape_cast %67 : vector<32x256xf32> to vector<2x16x256xf32>
    %c0_32 = arith.constant 0 : index
    %c0_33 = arith.constant 0 : index
    %69 = vector.load %arg10[%c0_32, %c0_33] : memref<16x256xf32, #tpu.memory_space<vmem>>, vector<16x256xf32>
    %70 = vector.shape_cast %69 : vector<16x256xf32> to vector<1x16x256xf32>
    %71 = vector.broadcast %70 : vector<1x16x256xf32> to vector<2x16x256xf32>
    %72 = arith.addf %68, %71 : vector<2x16x256xf32>
    %cst_34 = arith.constant 0.166666672 : f32
    %73 = vector.broadcast %cst_34 : f32 to vector<2x16x256xf32>
    %74 = arith.mulf %72, %73 : vector<2x16x256xf32>
    %cst_35 = arith.constant 5.000000e-01 : f32
    %75 = vector.broadcast %cst_35 : f32 to vector<2x16x256xf32>
    %76 = arith.addf %74, %75 : vector<2x16x256xf32>
    %cst_36 = arith.constant 0.000000e+00 : f32
    %cst_37 = arith.constant 1.000000e+00 : f32
    %77 = vector.broadcast %cst_36 : f32 to vector<2x16x256xf32>
    %78 = arith.maximumf %77, %76 : vector<2x16x256xf32>
    %79 = vector.broadcast %cst_37 : f32 to vector<2x16x256xf32>
    %80 = arith.minimumf %79, %78 : vector<2x16x256xf32>
    %81 = arith.mulf %72, %80 : vector<2x16x256xf32>
    %c0_38 = arith.constant 0 : index
    %c0_39 = arith.constant 0 : index
    %c0_40 = arith.constant 0 : index
    %82 = vector.load %arg11[%c0_38, %c0_39, %c0_40] : memref<2x16x256xf32, #tpu.memory_space<vmem>>, vector<2x16x256xf32>
    tpu.vector_store %arg11[%c0_38, %c0_39, %c0_40], %81 {strides = array<i32>} : memref<2x16x256xf32, #tpu.memory_space<vmem>>, vector<2x16x256xf32>,
    return
  }
  func.func @transform_0(%arg0: i32) -> (i32, i32, i32) {
    %c0_i32 = arith.constant 0 : i32
    %c0_i32_0 = arith.constant 0 : i32
    %c0_i32_1 = arith.constant 0 : i32
    return %arg0, %c0_i32, %c0_i32_0 : i32, i32, i32
  }
  func.func @transform_1(%arg0: i32) -> (i32, i32) {
    %c0_i32 = arith.constant 0 : i32
    %c0_i32_0 = arith.constant 0 : i32
    %c0_i32_1 = arith.constant 0 : i32
    return %c0_i32, %c0_i32_0 : i32, i32
  }
  func.func @transform_2(%arg0: i32) -> (i32, i32) {
    %c0_i32 = arith.constant 0 : i32
    %c0_i32_0 = arith.constant 0 : i32
    %c0_i32_1 = arith.constant 0 : i32
    return %c0_i32, %c0_i32_0 : i32, i32
  }
  func.func @transform_3(%arg0: i32) -> (i32, i32) {
    %c0_i32 = arith.constant 0 : i32
    %c0_i32_0 = arith.constant 0 : i32
    %c0_i32_1 = arith.constant 0 : i32
    return %c0_i32, %c0_i32_0 : i32, i32
  }
  func.func @transform_4(%arg0: i32) -> (i32, i32) {
    %c0_i32 = arith.constant 0 : i32
    %c0_i32_0 = arith.constant 0 : i32
    %c0_i32_1 = arith.constant 0 : i32
    return %c0_i32, %c0_i32_0 : i32, i32
  }
  func.func @transform_5(%arg0: i32) -> (i32, i32) {
    %c0_i32 = arith.constant 0 : i32
    %c0_i32_0 = arith.constant 0 : i32
    %c0_i32_1 = arith.constant 0 : i32
    return %c0_i32, %c0_i32_0 : i32, i32
  }
  func.func @transform_6(%arg0: i32) -> (i32, i32) {
    %c0_i32 = arith.constant 0 : i32
    %c0_i32_0 = arith.constant 0 : i32
    %c0_i32_1 = arith.constant 0 : i32
    return %c0_i32, %c0_i32_0 : i32, i32
  }
  func.func @transform_7(%arg0: i32) -> (i32, i32) {
    %c0_i32 = arith.constant 0 : i32
    %c0_i32_0 = arith.constant 0 : i32
    %c0_i32_1 = arith.constant 0 : i32
    return %c0_i32, %c0_i32_0 : i32, i32
  }
  func.func @transform_8(%arg0: i32) -> (i32, i32) {
    %c0_i32 = arith.constant 0 : i32
    %c0_i32_0 = arith.constant 0 : i32
    %c0_i32_1 = arith.constant 0 : i32
    return %c0_i32, %c0_i32_0 : i32, i32
  }
  func.func @transform_9(%arg0: i32) -> (i32, i32) {
    %c0_i32 = arith.constant 0 : i32
    %c0_i32_0 = arith.constant 0 : i32
    %c0_i32_1 = arith.constant 0 : i32
    return %c0_i32, %c0_i32_0 : i32, i32
  }
  func.func @transform_10(%arg0: i32) -> (i32, i32, i32) {
    %c0_i32 = arith.constant 0 : i32
    %c0_i32_0 = arith.constant 0 : i32
    %c0_i32_1 = arith.constant 0 : i32
    return %arg0, %c0_i32, %c0_i32_0 : i32, i32, i32
  }
}

</mosaic_0001>

<bundles_post_ra>
// kernel: tpu_custom_call.1
= control target key start
LH: loop header
LB: loop body
LE: loop exit
PB: predicated region body
PF: predicated region fallthrough
CT: control target
= control target key end

     0   :  { %s1611_s0 = inlined_call_operand.vmem [shape: f32[2,16,256], index: 0, kind: input, shape index: {}]   ;;  %s1612_s1 = inlined_call_operand.vmem [shape: f32[256,33], index: 1, kind: input, shape index: {}]   ;;  %s1613_s2 = inlined_call_operand.vmem [shape: f32[16,256], index: 2, kind: input, shape index: {}]   ;;  %s1614_s3 = inlined_call_operand.vmem [shape: f32[16,256], index: 3, kind: input, shape index: {}]   ;;  %s1615_s4 = inlined_call_operand.vmem [shape: f32[4,16], index: 4, kind: input, shape index: {}]   ;;  %s1616_s5 = inlined_call_operand.vmem [shape: f32[4,1], index: 5, kind: input, shape index: {}]   ;;  %s1617_s6 = inlined_call_operand.vmem [shape: f32[48,4], index: 6, kind: input, shape index: {}]   ;;  %s1618_s7 = inlined_call_operand.vmem [shape: f32[48,1], index: 7, kind: input, shape index: {}]   ;;  %s1619_s8 = inlined_call_operand.vmem [shape: f32[16,1], index: 8, kind: input, shape index: {}]   ;;  %s1620_s9 = inlined_call_operand.vmem [shape: f32[16,256], index: 9, kind: input, shape index: {}]   ;;  %s1621_s10 = inlined_call_operand.hbm [shape: f32[2,16,256], index: 10, kind: output, shape index: {}]  }
   0x1   :  { %v60_v0 = vld [vmem:[%s1612_s1 + $0x80] sm:$0xff]  ;;  %v61_v1 = vld [vmem:[%s1612_s1 + $0x88] sm:$0xff]  ;;  %v62_v5 = vld [vmem:[%s1612_s1 + $0x90] sm:$0xff] }
   0x2   :  { %v44_v2 = vld [vmem:[%s1612_s1] sm:$0xff]  ;;  %v1116_v3 = vpack.c.bf16 %v61_v1, %v60_v0  ;;  %v45_v4 = vld [vmem:[%s1612_s1 + $0x8] sm:$0xff]  ;;  %v63_v6 = vld [vmem:[%s1612_s1 + $0x98] sm:$0xff] }
   0x3   :  { %v1118_v7 = vpack.c.bf16 %v45_v4, %v44_v2  ;;  %v1120_v8 = vpack.c.bf16 %v63_v6, %v62_v5  ;;  %v46_v9 = vld [vmem:[%s1612_s1 + $0x10] sm:$0xff]  ;;  %v47_v10 = vld [vmem:[%s1612_s1 + $0x18] sm:$0xff]  ;;  %v64_v11 = vld [vmem:[%s1612_s1 + $0xa0] sm:$0xff] }
   0x4   :  { %1117 = vmatprep.subr.bf16.mxu0 %v1116_v3  ;;  %v65_v12 = vld [vmem:[%s1612_s1 + $0xa8] sm:$0xff]  ;;  %v1122_v13 = vpack.c.bf16 %v47_v10, %v46_v9  ;;  %v48_v15 = vld [vmem:[%s1612_s1 + $0x20] sm:$0xff]  ;;  %v66_v17 = vld [vmem:[%s1612_s1 + $0xb0] sm:$0xff] }
   0x5   :  { %1119 = vmatpush3.bf16.msra.mxu0 %v1118_v7  ;;  %v1124_v14 = vpack.c.bf16 %v65_v12, %v64_v11  ;;  %v49_v16 = vld [vmem:[%s1612_s1 + $0x28] sm:$0xff]  ;;  %v67_v18 = vld [vmem:[%s1612_s1 + $0xb8] sm:$0xff]  ;;  %v50_v21 = vld [vmem:[%s1612_s1 + $0x30] sm:$0xff] }
   0x6   :  { %1121 = vmatprep.subr.bf16.mxu0 %v1120_v8  ;;  %v1126_v19 = vpack.c.bf16 %v49_v16, %v48_v15  ;;  %v1128_v20 = vpack.c.bf16 %v67_v18, %v66_v17  ;;  %v51_v22 = vld [vmem:[%s1612_s1 + $0x38] sm:$0xff]  ;;  %v68_v23 = vld [vmem:[%s1612_s1 + $0xc0] sm:$0xff]  ;;  %v69_v24 = vld [vmem:[%s1612_s1 + $0xc8] sm:$0xff] }
   0x7   :  { %v1372_v25 = vld [vmem:[%s1611_s0 + $0x8] sm:$0xff]  ;;  %v1130_v26 = vpack.c.bf16 %v51_v22, %v50_v21  ;;  %v1132_v27 = vpack.c.bf16 %v69_v24, %v68_v23  ;;  %v52_v28 = vld [vmem:[%s1612_s1 + $0x40] sm:$0xff] }
   0x8   :  { %140 = vmatprep.mubr.f32.mxu0 %v1372_v25  ;;  %v53_v29 = vld [vmem:[%s1612_s1 + $0x48] sm:$0xff] }
   0x9   :  { %1123 = vmatpush3.bf16.msra.mxu0 %v1122_v13 }
   0xa   :  { %1125 = vmatprep.subr.bf16.mxu0 %v1124_v14 }
   0xd   :  { %1127 = vmatpush3.bf16.msra.mxu0 %v1126_v19 }
   0xe   :  { %1129 = vmatprep.subr.bf16.mxu0 %v1128_v20 }
   0xf   :  { %15 = vsyncpa [#allocation3], 0  ;;  %v70_v30 = vld [vmem:[%s1612_s1 + $0xd0] sm:$0xff]  ;;  %v71_v31 = vld [vmem:[%s1612_s1 + $0xd8] sm:$0xff]  ;;  %v1134_v32 = vpack.c.bf16 %v53_v29, %v52_v28  ;;  %v1250_v56 = vmov 0.0|0.0   ;;  %vm1251_vm0 = vmmov 0  }
  0x10   :  { %v1136_v33 = vpack.c.bf16 %v71_v31, %v70_v30  ;;  %v54_v34 = vld [vmem:[%s1612_s1 + $0x50] sm:$0xff]  ;;  %v55_v35 = vld [vmem:[%s1612_s1 + $0x58] sm:$0xff]  ;;  %v72_v36 = vld [vmem:[%s1612_s1 + $0xe0] sm:$0xff]  ;;  %1148 = vmatprep.subr.bf16.mxu1 %v1250_v56  ;;  %v1252_v57 = vmov 0.0   ;;  %v1253_v59 = vmov 0   ;;  %vm168_vm1 = vcmask 130048  }
  0x11   :  { %1131 = vmatpush3.bf16.msra.mxu0 %v1130_v26  ;;  %v73_v37 = vld [vmem:[%s1612_s1 + $0xe8] sm:$0xff]  ;;  %v1138_v38 = vpack.c.bf16 %v55_v35, %v54_v34  ;;  %v56_v40 = vld [vmem:[%s1612_s1 + $0x60] sm:$0xff]  ;;  %v74_v42 = vld [vmem:[%s1612_s1 + $0xf0] sm:$0xff]  ;;  %1084 = vmatprep.mubr.msk.f32.mxu1 %vm1251_vm0, %v1252_v57  ;;  %vm364_vm2 = vcmask 31744   ;;  %vm383_vm3 = vcmask 1043456   ;;  %s1255_s28 = smov 32  }
  0x12   :  { %1133 = vmatprep.subr.bf16.mxu0 %v1132_v27  ;;  %v1140_v39 = vpack.c.bf16 %v73_v37, %v72_v36  ;;  %v57_v41 = vld [vmem:[%s1612_s1 + $0x68] sm:$0xff]  ;;  %v75_v43 = vld [vmem:[%s1612_s1 + $0xf8] sm:$0xff]  ;;  %v58_v46 = vld [vmem:[%s1612_s1 + $0x70] sm:$0xff]  ;;  %1174 = vset.pattern.permute.xlu0 %v1253_v59 }
  0x13   :  { %v1142_v44 = vpack.c.bf16 %v57_v41, %v56_v40  ;;  %v1144_v45 = vpack.c.bf16 %v75_v43, %v74_v42  ;;  %v59_v47 = vld [vmem:[%s1612_s1 + $0x78] sm:$0xff]  ;;  %v1420_v49 = vld [vmem:[%s1611_s0] sm:$0xff]  ;;  %v1432_v51 = vld [vmem:[%s1611_s0 + $0x10] sm:$0xff]  ;;  %1175 = vset.pattern.permute.xlu1 %v1253_v59 }
  0x14   :  { %v1146_v48 = vpack.c.bf16 %v59_v47, %v58_v46  ;;  %v1425_v50 = vld [vmem:[%s1611_s0 + $0x18] sm:$0xff]  ;;  %v1437_v52 = vld [vmem:[%s1611_s0 + $0x28] sm:$0xff]  ;;  %v1444_v53 = vld [vmem:[%s1611_s0 + $0x20] sm:$0xff] }
  0x15   :  { %1135 = vmatpush3.bf16.msra.mxu0 %v1134_v32  ;;  %v1449_v54 = vld [vmem:[%s1611_s0 + $0x38] sm:$0xff]  ;;  %v1456_v55 = vld [vmem:[%s1611_s0 + $0x30] sm:$0xff]  ;;  %v162_v58 = vld [vmem:[%s1616_s5] sm:$0xf] }
  0x16   :  { %1137 = vmatprep.subr.bf16.mxu0 %v1136_v33  ;;  %165 = vperm.xlu0 %1174, %v162_v58   ;;  %v330_v60 = vld [vmem:[%s1618_s7 + $0x10] sm:$0xff]  ;;  %v329_v61 = vld [vmem:[%s1618_s7 + $0x8] sm:$0xff]  ;;  %v161_v8 = vld [vmem:[%s1615_s4] sm:$0xf] }
  0x17   :  { %v322_v13 = vld [vmem:[%s1617_s6] sm:$0xff]  ;;  %v331_v14 = vld [vmem:[%s1618_s7 + $0x18] sm:$0xff]  ;;  %v323_v30 = vld [vmem:[%s1617_s6 + $0x8] sm:$0xff] }
  0x18   :  { %351 = vperm.xlu1 %1175, %v331_v14   ;;  %v328_v15 = vld [vmem:[%s1618_s7] sm:$0xff]  ;;  %v324_v32 = vld [vmem:[%s1617_s6 + $0x10] sm:$0xff]  ;;  %v325_v34 = vld [vmem:[%s1617_s6 + $0x18] sm:$0xff] }
  0x19   :  { %1139 = vmatpush3.bf16.msra.mxu0 %v1138_v38  ;;  %v326_v36 = vld [vmem:[%s1617_s6 + $0x20] sm:$0xff]  ;;  %v327_v38 = vld [vmem:[%s1617_s6 + $0x28] sm:$0xff]  ;;  %v657_v40 = vld [vmem:[%s1613_s2 + $0x18] sm:$0xff] }
  0x1a   :  { %1141 = vmatprep.subr.bf16.mxu0 %v1140_v39  ;;  %346 = vperm.xlu0 %1174, %v330_v60   ;;  %v655_v39 = vld [vmem:[%s1613_s2 + $0x8] sm:$0xff]  ;;  %v654_v42 = vld [vmem:[%s1613_s2] sm:$0xff]  ;;  %v656_v43 = vld [vmem:[%s1613_s2 + $0x10] sm:$0xff]  ;;  %s1254_s2 = smov 112  }
  0x1b   :  { %v1154_v41 = vpack.c.bf16 %v657_v40, %v655_v39  ;;  %v762_v46 = vld [vmem:[%s1614_s3 + $0x18] sm:$0xff]  ;;  %v759_v47 = vld [vmem:[%s1614_s3] sm:$0xff] }
  0x1c   :  { %336 = vperm.xlu1 %1175, %v328_v15  }
  0x1d   :  { %1143 = vmatpush3.bf16.msra.mxu0 %v1142_v44  ;;  %v1156_v44 = vpack.c.bf16 %v656_v43, %v654_v42 }
  0x1e   :  { %1145 = vmatprep.subr.bf16.mxu0 %v1144_v45  ;;  %341 = vperm.xlu0 %1174, %v329_v61   ;;  %v760_v45 = vld [vmem:[%s1614_s3 + $0x8] sm:$0xff] }
  0x21   :  { %1147 = vmatpush3.bf16.msra.mxu0 %v1146_v48  ;;  %v1158_v48 = vpack.c.bf16 %v762_v46, %v760_v45 }
  0x23   :  { %1159 = vmatprep.subr.bf16.mxu0 %v1158_v48 }
  0x24   :  { %141 = vmatmul.mubr.f32.vlgmr.msra.gmra.mrb[0].mxu0 %v1420_v49 }
  0x25   :  { %145 = vmatprep.mubr.f32.mxu0 %v1425_v50 }
  0x28   :  { %146 = vmatmul.mubr.f32.gmra.mrb[2].mxu0 %v1432_v51 }
  0x29   :  { %150 = vmatprep.mubr.f32.mxu0 %v1437_v52 }
  0x2c   :  { %151 = vmatmul.mubr.f32.gmra.mrb[4].mxu0 %v1444_v53 }
  0x2d   :  { %155 = vmatprep.mubr.f32.mxu0 %v1449_v54 }
  0x30   :  { %156 = vmatmul.mubr.f32.gmra.mrb[6].mxu0 %v1456_v55 }
  0x31   :  { %847 = vmatprep.mubr.f32.mxu0 %v1252_v57 }
  0x95   :  { %v166_v16 = vpop.permute.xlu0 %165 }
  0x97   :  { %v352_v59 = vpop.permute.xlu1 %351 }
  0x99   :  { %v347_v60 = vpop.permute.xlu0 %346 }
  0x9b   :  { %v337_v61 = vpop.permute.xlu1 %336 }
  0xf7   :  { %v1048_v62 = vpop.f32.mrb[0].mxu0 }
  0xf8   :  { %v1049_v63 = vpop.f32.mrb[1].mxu0 }
  0xf9   :  { %v1050_v0 = vadd.f32 %v1049_v63, %v1048_v62  ;;  %v342_v62 = vpop.permute.xlu0 %341 }
  0xfb   :  { %v1051_v1 = vpop.f32.mrb[2].mxu0 }
  0xfc   :  { %v1052_v2 = vpop.f32.mrb[3].mxu0 }
  0xfd   :  { %v1053_v3 = vadd.f32 %v1052_v2, %v1051_v1 }
  0xff   :  { %v1054_v4 = vpop.f32.mrb[4].mxu0  ;;  %v1149_v5 = vpack.c.bf16 %v1053_v3, %v1050_v0 }
 0x100   :  { %v1055_v6 = vpop.f32.mrb[5].mxu0 }
 0x101   :  { %v1056_v7 = vadd.f32 %v1055_v6, %v1054_v4  ;;  %1150 = vmatpush3.bf16.msra.mxu1 %v1149_v5 }
 0x102   :  { %1151 = vmatprep.subr.bf16.mxu1 %v1250_v56  ;;  %v761_v56 = vld [vmem:[%s1614_s3 + $0x10] sm:$0xff] }
 0x103   :  { %v1057_v9 = vpop.f32.mrb[6].mxu0  ;;  %v1543_v58 = vpack.c.bf16 %v761_v56, %v759_v47 }
 0x104   :  { %v1058_v10 = vpop.f32.mrb[7].mxu0  ;;  %1085 = vmatmul.mubr.msk.f32.vlgmr.msra.gmra.mrb[0].mxu1 %vm168_vm1, %v161_v8 }
 0x105   :  { %v1059_v11 = vadd.f32 %v1058_v10, %v1057_v9  ;;  %1091 = vmatprep.mubr.msk.f32.mxu1 %vm1251_vm0, %v1252_v57  ;;  %1161 = vmatpush1.bf16.msra.mxu0 %v1543_v58 }
 0x107   :  { %v1152_v12 = vpack.c.bf16 %v1059_v11, %v1056_v7 }
 0x109   :  { %1153 = vmatpush3.bf16.msra.mxu1 %v1152_v12 }
 0x10c   :  { %1092 = vmatmul.mubr.msk.f32.vlgmr.msra.gmra.mrb[2].mxu1 %vm168_vm1, %v161_v8 }
 0x10d   :  { %1096 = vmatprep.mubr.msk.f32.mxu1 %vm364_vm2, %v322_v13 }
 0x1d7   :  { %v238_v17 = vpop.f32.mrb[0].mxu1 }
 0x1d8   :  { %v239_v18 = vadd.f32 %v238_v17, %v166_v16  ;;  %v1086_v19 = vpop.f32.mrb[1].mxu1 }
 0x1da   :  { %v312_v20 = vmul.f32 0.16666667, %v239_v18 }
 0x1dc   :  { %v314_v21 = vadd.f32 0.5, %v312_v20 }
 0x1de   :  { %v316_v22 = vmax.f32 %v314_v21, 0.0 }
 0x1df   :  { %v308_v23 = vpop.f32.mrb[2].mxu1 }
 0x1e0   :  { %v318_v24 = vmin.f32 %v316_v22, 1.0  ;;  %v309_v26 = vadd.f32 %v308_v23, %v166_v16  ;;  %v1093_v27 = vpop.f32.mrb[3].mxu1 }
 0x1e2   :  { %v320_v28 = vmul.f32 %v318_v24, %v239_v18  ;;  %v313_v29 = vmul.f32 0.16666667, %v309_v26 }
 0x1e4   :  { %v315_v31 = vadd.f32 0.5, %v313_v29  ;;  %1094 = vmatprep.subr.msk.mxu1 %vm383_vm3, %v320_v28 }
 0x1e5   :  { %1095 = vmatpush3.msk.msra.mxu1 %vm383_vm3, %v320_v28 }
 0x1e6   :  { %v317_v33 = vmax.f32 %v315_v31, 0.0  ;;  %1097 = vmatmul.mubr.msk.f32.vlgmr.msra.gmra.mrb[4].mxu1 %vm364_vm2, %v323_v30 }
 0x1e7   :  { %1099 = vmatprep.mubr.msk.f32.mxu1 %vm364_vm2, %v324_v32 }
 0x1e8   :  { %v319_v35 = vmin.f32 %v317_v33, 1.0 }
 0x1ea   :  { %v321_v37 = vmul.f32 %v319_v35, %v309_v26  ;;  %1100 = vmatmul.mubr.msk.f32.gmra.mrb[6].mxu1 %vm364_vm2, %v325_v34 }
 0x1eb   :  { %1102 = vmatprep.mubr.msk.f32.mxu1 %vm364_vm2, %v326_v36 }
 0x1ec   :  { %1105 = vmatprep.subr.msk.mxu1 %vm383_vm3, %v321_v37 }
 0x1ed   :  { %1106 = vmatpush3.msk.msra.mxu1 %vm383_vm3, %v321_v37 }
 0x1ee   :  { %1103 = vmatmul.mubr.msk.f32.gmra.mrb[8].mxu1 %vm364_vm2, %v327_v38  ;;  %1155 = vmatprep.subr.bf16.mxu1 %v1154_v41 }
 0x1ef   :  { %1107 = vmatprep.mubr.msk.f32.mxu1 %vm364_vm2, %v322_v13 }
 0x1f2   :  { %1108 = vmatmul.mubr.msk.f32.vlgmr.msra.gmra.mrb[10].mxu1 %vm364_vm2, %v323_v30 }
 0x1f3   :  { %1110 = vmatprep.mubr.msk.f32.mxu1 %vm364_vm2, %v324_v32  ;;  %1157 = vmatpush1.bf16.msra.mxu1 %v1156_v44 }
 0x1f4   :  { %1162 = vmatprep.subr.bf16.mxu1 %v1158_v48 }
 0x1f6   :  { %1111 = vmatmul.mubr.msk.f32.gmra.mrb[12].mxu1 %vm364_vm2, %v325_v34 }
 0x1f7   :  { %1113 = vmatprep.mubr.msk.f32.mxu1 %vm364_vm2, %v326_v36 }
 0x1fa   :  { %1114 = vmatmul.mubr.msk.f32.gmra.mrb[14].mxu1 %vm364_vm2, %v327_v38 }
 0x1fb   :  { %734 = vmatprep.mubr.f32.mxu1 %v1252_v57 }
 0x2b9   :  { %v1098_v63 = vpop.f32.mrb[4].mxu1 }
 0x2ba   :  { %v459_v0 = vadd.f32 %v1098_v63, %v342_v62  ;;  %v453_v1 = vpop.f32.mrb[5].mxu1 }
 0x2bb   :  { %v454_v2 = vadd.f32 %v453_v1, %v337_v61  ;;  %v333_v1 = vld [vmem:[%s1618_s7 + $0x28] sm:$0xff] }
 0x2bc   :  { %v581_v3 = vsub.f32 0.0, %v459_v0 }
 0x2bd   :  { %v580_v4 = vsub.f32 0.0, %v454_v2  ;;  %v1101_v5 = vpop.f32.mrb[6].mxu1 }
 0x2be   :  { %v586_v6 = vmul.f32 1.442695, %v581_v3  ;;  %v469_v7 = vadd.f32 %v1101_v5, %v352_v59  ;;  %v463_v8 = vpop.f32.mrb[7].mxu1  ;;  %v332_v3 = vld [vmem:[%s1618_s7 + $0x20] sm:$0xff] }
 0x2bf   :  { %v584_v9 = vmul.f32 1.442695, %v580_v4  ;;  %v464_v10 = vadd.f32 %v463_v8, %v347_v60  ;;  %v641_v4 = vld [vmem:[%s1619_s8 + $0x8] sm:$0xff]  ;;  %v1256_v8 = vmov 32  }
 0x2c0   :  { %1178 = vpow2.f32 %v586_v6  ;;  %v601_v11 = vsub.f32 0.0, %v469_v7  ;;  %v640_v7 = vld [vmem:[%s1619_s8] sm:$0xff] }
 0x2c1   :  { %1180 = vpow2.f32 %v584_v9  ;;  %v600_v12 = vsub.f32 0.0, %v464_v10  ;;  %v1546_v13 = vpop.f32.mrb[8].mxu1 }
 0x2c2   :  { %v606_v14 = vmul.f32 1.442695, %v601_v11  ;;  %v1548_v15 = vpop.f32.mrb[9].mxu1 }
 0x2c3   :  { %v604_v16 = vmul.f32 1.442695, %v600_v12 }
 0x2c4   :  { %1182 = vpow2.f32 %v606_v14 }
 0x2c5   :  { %1184 = vpow2.f32 %v604_v16  ;;  %v1109_v17 = vpop.f32.mrb[10].mxu1 }
 0x2c6   :  { %v557_v18 = vadd.f32 %v1109_v17, %v342_v62  ;;  %v551_v19 = vpop.f32.mrb[11].mxu1 }
 0x2c7   :  { %v552_v20 = vadd.f32 %v551_v19, %v337_v61 }
 0x2c8   :  { %v583_v21 = vsub.f32 0.0, %v557_v18 }
 0x2c9   :  { %v582_v22 = vsub.f32 0.0, %v552_v20  ;;  %v1112_v23 = vpop.f32.mrb[12].mxu1 }
 0x2ca   :  { %v1179_v24 = vpop.eup %1178  ;;  %v590_v26 = vmul.f32 1.442695, %v583_v21  ;;  %v567_v27 = vadd.f32 %v1112_v23, %v352_v59  ;;  %v561_v28 = vpop.f32.mrb[13].mxu1 }
 0x2cb   :  { %v1181_v29 = vpop.eup %1180  ;;  %v593_v30 = vadd.f32 1.0, %v1179_v24  ;;  %v588_v31 = vmul.f32 1.442695, %v582_v22  ;;  %v562_v32 = vadd.f32 %v561_v28, %v347_v60 }
 0x2cc   :  { %v592_v33 = vadd.f32 1.0, %v1181_v29  ;;  %1186 = vpow2.f32 %v590_v26  ;;  %v603_v34 = vsub.f32 0.0, %v567_v27 }
 0x2cd   :  { %1188 = vrcp.f32 %v593_v30  ;;  %v602_v35 = vsub.f32 0.0, %v562_v32  ;;  %v1115_v5 = vpop.f32.mrb[14].mxu1 }
 0x2ce   :  { %v1183_v36 = vpop.eup %1182  ;;  %1190 = vrcp.f32 %v592_v33  ;;  %v610_v37 = vmul.f32 1.442695, %v603_v34  ;;  %v571_v6 = vpop.f32.mrb[15].mxu1 }
 0x2cf   :  { %v1185_v38 = vpop.eup %1184  ;;  %v613_v39 = vadd.f32 1.0, %v1183_v36  ;;  %1192 = vpow2.f32 %v588_v31  ;;  %v608_v40 = vmul.f32 1.442695, %v602_v35 }
 0x2d0   :  { %v612_v41 = vadd.f32 1.0, %v1185_v38  ;;  %1194 = vpow2.f32 %v610_v37 }
 0x2d1   :  { %1196 = vrcp.f32 %v613_v39 }
 0x2d2   :  { %1198 = vrcp.f32 %v612_v41 }
 0x2d3   :  { %1200 = vpow2.f32 %v608_v40 }
 0x2d6   :  { %v1187_v42 = vpop.eup %1186 }
 0x2d7   :  { %v1189_v43 = vpop.eup %1188  ;;  %v595_v56 = vadd.f32 1.0, %v1187_v42 }
 0x2d8   :  { %v1191_v44 = vpop.eup %1190 }
 0x2d9   :  { %v1193_v45 = vpop.eup %1192  ;;  %1008 = vmatmul.mubr.msk.f32.vlgmr.msra.gmra.mrb[16].mxu1 %vm168_vm1, %v1191_v44 }
 0x2da   :  { %v1195_v46 = vpop.eup %1194  ;;  %v594_v47 = vadd.f32 1.0, %v1193_v45  ;;  %740 = vmatprep.mubr.f32.mxu1 %v1252_v57  ;;  %1163 = vmatpush1.bf16.msra.mxu1 %v1543_v58 }
 0x2db   :  { %v1197_v48 = vpop.eup %1196  ;;  %v615_v59 = vadd.f32 1.0, %v1195_v46 }
 0x2dc   :  { %v1199_v60 = vpop.eup %1198  ;;  %1202 = vrcp.f32 %v594_v47  ;;  %769 = vrot.lane.b32.xlu0 %v1197_v48, %s1254_s2 }
 0x2dd   :  { %v1201_v61 = vpop.eup %1200  ;;  %1204 = vrcp.f32 %v615_v59  ;;  %767 = vrot.lane.b32.xlu1 %v1199_v60, %s1254_s2  ;;  %1009 = vmatmul.mubr.msk.f32.gmra.mrb[18].mxu1 %vm168_vm1, %v1189_v43 }
 0x2de   :  { %v614_v62 = vadd.f32 1.0, %v1201_v61  ;;  %746 = vmatprep.mubr.f32.mxu1 %v1252_v57  ;;  %1206 = vrcp.f32 %v595_v56 }
 0x2e0   :  { %1208 = vrcp.f32 %v614_v62 }
 0x2e6   :  { %v1203_v63 = vpop.eup %1202 }
 0x2e7   :  { %v1205_v0 = vpop.eup %1204  ;;  %1010 = vmatmul.mubr.msk.f32.gmra.mrb[20].mxu1 %vm168_vm1, %v1203_v63 }
 0x2e8   :  { %773 = vrot.lane.b32.xlu0 %v1205_v0, %s1254_s2  ;;  %752 = vmatprep.mubr.f32.mxu1 %v1252_v57  ;;  %v1207_v58 = vpop.eup %1206 }
 0x2ea   :  { %v1209_v2 = vpop.eup %1208 }
 0x2eb   :  { %771 = vrot.lane.b32.xlu1 %v1209_v2, %s1254_s2  ;;  %1011 = vmatmul.mubr.msk.f32.gmra.mrb[22].mxu1 %vm168_vm1, %v1207_v58 }
 0x2ec   :  { %361 = vperm.xlu0 %1174, %v333_v1   ;;  %865 = vmatprep.mubr.f32.mxu1 %v1252_v57 }
 0x2ef   :  { %356 = vperm.xlu1 %1175, %v332_v3   ;;  %v916_v3 = vld [vmem:[%s1620_s9] sm:$0xff] }
 0x2f0   :  { %646 = vrot.lane.b32.xlu0 %v641_v4, %s1255_s28 }
 0x2f1   :  { %1177 = vset.pattern.permute.xlu0 %v1256_v8 }
 0x2f3   :  { %644 = vrot.lane.b32.xlu1 %v640_v7, %s1255_s28  ;;  %v917_v7 = vld [vmem:[%s1620_s9 + $0x8] sm:$0xff] }
 0x2f4   :  { %1176 = vset.pattern.permute.xlu1 %v1256_v8 }
 0x34e   :  { %v770_v10 = vpop.permute.xlu0 %769 }
 0x34f   :  { %v768_v9 = vpop.permute.xlu1 %767 }
 0x350   :  { %1012 = vmatmul.mubr.msk.f32.vlgmr.msra.gmra.mrb[8].mxu0 %vm168_vm1, %v768_v9 }
 0x351   :  { %853 = vmatprep.mubr.f32.mxu0 %v1252_v57 }
 0x354   :  { %1013 = vmatmul.mubr.msk.f32.gmra.mrb[10].mxu0 %vm168_vm1, %v770_v10 }
 0x355   :  { %859 = vmatprep.mubr.f32.mxu0 %v1252_v57 }
 0x35a   :  { %v774_v11 = vpop.permute.xlu0 %773 }
 0x35b   :  { %1015 = vmatmul.mubr.msk.f32.vlgmr.msra.gmra.mrb[24].mxu1 %vm168_vm1, %v774_v11 }
 0x35d   :  { %v772_v12 = vpop.permute.xlu1 %771 }
 0x35e   :  { %1014 = vmatmul.mubr.msk.f32.gmra.mrb[12].mxu0 %vm168_vm1, %v772_v12 }
 0x36b   :  { %v362_v14 = vpop.permute.xlu0 %361 }
 0x36c   :  { %v479_v16 = vadd.f32 %v1546_v13, %v362_v14  ;;  %v577_v17 = vadd.f32 %v1115_v5, %v362_v14 }
 0x36e   :  { %v621_v18 = vsub.f32 0.0, %v479_v16  ;;  %v357_v19 = vpop.permute.xlu1 %356  ;;  %v623_v20 = vsub.f32 0.0, %v577_v17 }
 0x36f   :  { %v474_v21 = vadd.f32 %v1548_v15, %v357_v19  ;;  %v572_v22 = vadd.f32 %v571_v6, %v357_v19  ;;  %v647_v35 = vpop.permute.xlu0 %646  ;;  %v918_v19 = vld [vmem:[%s1620_s9 + $0x10] sm:$0xff] }
 0x370   :  { %v626_v23 = vmul.f32 1.442695, %v621_v18  ;;  %v630_v57 = vmul.f32 1.442695, %v623_v20 }
 0x371   :  { %v620_v24 = vsub.f32 0.0, %v474_v21  ;;  %v622_v26 = vsub.f32 0.0, %v572_v22  ;;  %v919_v22 = vld [vmem:[%s1620_s9 + $0x18] sm:$0xff]  ;;  %s1257_s9 = smov [#allocation2]  }
 0x372   :  { %1210 = vpow2.f32 %v626_v23  ;;  %v645_v38 = vpop.permute.xlu1 %644  ;;  %s981_s15 = sshll.u32 %s1257_s9, 4  ;;  %s982_s15 = int_to_ptr.vmem [resolvable:$true] %s981_s15 }
 0x373   :  { %v624_v27 = vmul.f32 1.442695, %v620_v24  ;;  %v628_v28 = vmul.f32 1.442695, %v622_v26  ;;  %s1226_s16 = scalar_lea.vmem %s982_s15, 1024  ;;  %p1231_p1 = scmp.lt.s32.totalorder %s982_s15, %s982_s15 }
 0x374   :  { %p1227_p0 = scmp.ne.s32.totalorder %s982_s15, %s1226_s16  ;;  %p1232_p2 = scmp.lt.s32.totalorder %s1226_s16, %s1226_s16 }
 0x375   :  { %1212 = vpow2.f32 %v624_v27 }
 0x376   :  { %1214 = vpow2.f32 %v628_v28  ;;  %p1233_p3 = por %p1232_p2, %p1231_p1 }
 0x377   :  { %1216 = vpow2.f32 %v630_v57 }
 0x378   :  { %p1234_p4 = pnand %p1233_p3, %p1227_p0 }
 0x37c   :  { %v1211_v29 = vpop.eup %1210 }
 0x37d   :  { %v633_v30 = vadd.f32 1.0, %v1211_v29 }
 0x37f   :  { %v1213_v13 = vpop.eup %1212  ;;  %1218 = vrcp.f32 %v633_v30 }
 0x380   :  { %v1215_v31 = vpop.eup %1214  ;;  %v632_v32 = vadd.f32 1.0, %v1213_v13 }
 0x381   :  { %v1217_v33 = vpop.eup %1216  ;;  %v634_v34 = vadd.f32 1.0, %v1215_v31 }
 0x382   :  { %1220 = vrcp.f32 %v632_v32  ;;  %v635_v15 = vadd.f32 1.0, %v1217_v33 }
 0x383   :  { %1222 = vrcp.f32 %v634_v34 }
 0x384   :  { %1224 = vrcp.f32 %v635_v15 }
 0x389   :  { %v1219_v36 = vpop.eup %1218 }
 0x38a   :  { %v651_v37 = vmul.f32 %v1219_v36, %v647_v35 }
 0x38c   :  { %v1221_v39 = vpop.eup %1220  ;;  %887 = vperm.xlu0 %1177, %v651_v37  }
 0x38d   :  { %v650_v40 = vmul.f32 %v1221_v39, %v645_v38  ;;  %v1223_v41 = vpop.eup %1222 }
 0x38e   :  { %v652_v42 = vmul.f32 %v1223_v41, %v645_v38  ;;  %v1225_v43 = vpop.eup %1224 }
 0x38f   :  { %882 = vperm.xlu1 %1176, %v650_v40   ;;  %v653_v44 = vmul.f32 %v1225_v43, %v647_v35 }
 0x393   :  { %892 = vperm.xlu1 %1176, %v652_v42  }
 0x397   :  { %897 = vperm.xlu1 %1176, %v653_v44  }
 0x3ac   :  { %v736_v45 = vpop.f32.mrb[16].mxu1 }
 0x3ad   :  { %v738_v46 = vpop.f32.mrb[17].mxu1 }
 0x3b0   :  { %v742_v47 = vpop.f32.mrb[18].mxu1 }
 0x3b1   :  { %v744_v48 = vpop.f32.mrb[19].mxu1 }
 0x3ba   :  { %v748_v56 = vpop.f32.mrb[20].mxu1 }
 0x3bb   :  { %v750_v59 = vpop.f32.mrb[21].mxu1 }
 0x3be   :  { %v754_v60 = vpop.f32.mrb[22].mxu1 }
 0x3bf   :  { %v756_v61 = vpop.f32.mrb[23].mxu1 }
 0x40b   :  { %v888_v10 = vpop.permute.xlu0 %887 }
 0x40e   :  { %v883_v63 = vpop.permute.xlu1 %882 }
 0x412   :  { %v893_v14 = vpop.permute.xlu1 %892 }
 0x416   :  { %v898_v13 = vpop.permute.xlu1 %897 }
 0x423   :  { %v849_v62 = vpop.f32.mrb[8].mxu0 }
 0x424   :  { %v872_v0 = vmul.f32 %v849_v62, %v736_v45  ;;  %v851_v58 = vpop.f32.mrb[9].mxu0 }
 0x425   :  { %v873_v1 = vmul.f32 %v851_v58, %v738_v46 }
 0x426   :  { %v900_v2 = vmul.f32 %v883_v63, %v872_v0 }
 0x427   :  { %v901_v4 = vmul.f32 %v883_v63, %v873_v1  ;;  %v855_v5 = vpop.f32.mrb[10].mxu0 }
 0x428   :  { %v908_v6 = vmul.f32 %v900_v2, %v1420_v49  ;;  %v874_v8 = vmul.f32 %v855_v5, %v742_v47  ;;  %v857_v9 = vpop.f32.mrb[11].mxu0 }
 0x429   :  { %v909_v11 = vmul.f32 %v901_v4, %v1372_v25  ;;  %v875_v12 = vmul.f32 %v857_v9, %v744_v48 }
 0x42a   :  { %v920_v16 = vadd.f32 %v916_v3, %v908_v6  ;;  %v902_v17 = vmul.f32 %v888_v10, %v874_v8 }
 0x42b   :  { %v921_v18 = vadd.f32 %v917_v7, %v909_v11  ;;  %v903_v20 = vmul.f32 %v888_v10, %v875_v12 }
 0x42c   :  { %v928_v49 = vmul.f32 0.16666667, %v920_v16  ;;  %v910_v21 = vmul.f32 %v902_v17, %v1432_v51 }
 0x42d   :  { %v929_v23 = vmul.f32 0.16666667, %v921_v18  ;;  %v911_v25 = vmul.f32 %v903_v20, %v1425_v50 }
 0x42e   :  { %v936_v24 = vadd.f32 0.5, %v928_v49  ;;  %v922_v26 = vadd.f32 %v918_v19, %v910_v21  ;;  %v867_v57 = vpop.f32.mrb[24].mxu1 }
 0x42f   :  { %v937_v27 = vadd.f32 0.5, %v929_v23  ;;  %v923_v28 = vadd.f32 %v919_v22, %v911_v25  ;;  %v878_v29 = vmul.f32 %v867_v57, %v754_v60  ;;  %v869_v30 = vpop.f32.mrb[25].mxu1 }
 0x430   :  { %v944_v31 = vmax.f32 %v936_v24, 0.0  ;;  %v930_v32 = vmul.f32 0.16666667, %v922_v26  ;;  %v879_v33 = vmul.f32 %v869_v30, %v756_v61 }
 0x431   :  { %v945_v34 = vmax.f32 %v937_v27, 0.0  ;;  %v931_v51 = vmul.f32 0.16666667, %v923_v28  ;;  %v906_v15 = vmul.f32 %v898_v13, %v878_v29  ;;  %v861_v35 = vpop.f32.mrb[12].mxu0 }
 0x432   :  { %v952_v36 = vmin.f32 %v944_v31, 1.0  ;;  %v938_v37 = vadd.f32 0.5, %v930_v32  ;;  %v876_v38 = vmul.f32 %v861_v35, %v748_v56  ;;  %v907_v39 = vmul.f32 %v898_v13, %v879_v33  ;;  %v863_v50 = vpop.f32.mrb[13].mxu0 }
 0x433   :  { %v953_v40 = vmin.f32 %v945_v34, 1.0  ;;  %v939_v41 = vadd.f32 0.5, %v931_v51  ;;  %v914_v42 = vmul.f32 %v906_v15, %v1456_v55  ;;  %v877_v43 = vmul.f32 %v863_v50, %v750_v59 }
 0x434   :  { %v960_v44 = vmul.f32 %v952_v36, %v920_v16  ;;  %v946_v45 = vmax.f32 %v938_v37, 0.0  ;;  %v904_v46 = vmul.f32 %v893_v14, %v876_v38  ;;  %v915_v47 = vmul.f32 %v907_v39, %v1449_v54 }
 0x435   :  { %v961_v48 = vmul.f32 %v953_v40, %v921_v18  ;;  %v947_v60 = vmax.f32 %v939_v41, 0.0  ;;  %v926_v61 = vadd.f32 %v918_v19, %v914_v42  ;;  %v905_v62 = vmul.f32 %v893_v14, %v877_v43 }
 0x436   :  { %968 = vst [vmem:[#allocation2] sm:$0xff] %v960_v44  ;;  %v954_v63 = vmin.f32 %v946_v45, 1.0  ;;  %v912_v56 = vmul.f32 %v904_v46, %v1444_v53  ;;  %v927_v0 = vadd.f32 %v919_v22, %v915_v47 }
 0x437   :  { %969 = vst [vmem:[#allocation2 + $0x8] sm:$0xff] %v961_v48  ;;  %v955_v58 = vmin.f32 %v947_v60, 1.0  ;;  %v934_v1 = vmul.f32 0.16666667, %v926_v61  ;;  %v913_v55 = vmul.f32 %v905_v62, %v1437_v52 }
 0x438   :  { %v962_v59 = vmul.f32 %v954_v63, %v922_v26  ;;  %v924_v2 = vadd.f32 %v916_v3, %v912_v56  ;;  %v935_v4 = vmul.f32 0.16666667, %v927_v0 }
 0x439   :  { %v963_v5 = vmul.f32 %v955_v58, %v923_v28  ;;  %v942_v6 = vadd.f32 0.5, %v934_v1  ;;  %v925_v54 = vadd.f32 %v917_v7, %v913_v55 }
 0x43a   :  { %970 = vst [vmem:[#allocation2 + $0x10] sm:$0xff] %v962_v59  ;;  %v932_v8 = vmul.f32 0.16666667, %v924_v2  ;;  %v943_v9 = vadd.f32 0.5, %v935_v4 }
 0x43b   :  { %971 = vst [vmem:[#allocation2 + $0x18] sm:$0xff] %v963_v5  ;;  %v950_v10 = vmax.f32 %v942_v6, 0.0  ;;  %v933_v11 = vmul.f32 0.16666667, %v925_v54 }
 0x43c   :  { %v940_v12 = vadd.f32 0.5, %v932_v8  ;;  %v951_v53 = vmax.f32 %v943_v9, 0.0 }
 0x43d   :  { %v958_v14 = vmin.f32 %v950_v10, 1.0  ;;  %v941_v16 = vadd.f32 0.5, %v933_v11 }
 0x43e   :  { %v948_v17 = vmax.f32 %v940_v12, 0.0  ;;  %v959_v18 = vmin.f32 %v951_v53, 1.0 }
 0x43f   :  { %v966_v19 = vmul.f32 %v958_v14, %v926_v61  ;;  %v949_v52 = vmax.f32 %v941_v16, 0.0 }
 0x440   :  { %v956_v20 = vmin.f32 %v948_v17, 1.0  ;;  %v967_v3 = vmul.f32 %v959_v18, %v927_v0 }
 0x441   :  { %974 = vst [vmem:[#allocation2 + $0x30] sm:$0xff] %v966_v19  ;;  %v957_v7 = vmin.f32 %v949_v52, 1.0 }
 0x442   :  { %v964_v49 = vmul.f32 %v956_v20, %v924_v2  ;;  %975 = vst [vmem:[#allocation2 + $0x38] sm:$0xff] %v967_v3 }
 0x443   :  { %v965_v21 = vmul.f32 %v957_v7, %v925_v54 }
 0x444   :  { %972 = vst [vmem:[#allocation2 + $0x20] sm:$0xff] %v964_v49 }
 0x445   :  { %973 = vst [vmem:[#allocation2 + $0x28] sm:$0xff] %v965_v21 }
 0x446   :  { %1237 = shalt.err (!%p1234_p4)
}
 0x447   :  { %s1238_s18 = scalar_lea.hbm %s1621_s10, 1024 }
 0x448   :  { %p1239_p5 = scmp.ne.s32.totalorder %s1621_s10, %s1238_s18  ;;  %p1242_p6 = scmp.lt.u32.totalorder %s1238_s18, %s1621_s10 }
 0x44a   :  { %p1244_p7 = pnand %p1242_p6, %p1239_p5 }
 0x44c   :  { %1247 = shalt.err (!%p1244_p7)
}
 0x44d   :  { %s1258_s22 = smov 256   ;;  %s1259_s23 = smov 16  }
 0x44e   :  { %987 = dma.vmem_to_hbm [thread:$0]  %s982_s15, 1024, %s1621_s10, [#allocation3], %s1258_s22, %s1258_s22, %s1259_s23  }
 0x44f   :  { %1248 = dma.done.wait [#allocation3], 1024  }
 0x450   :  { %1249 = vsyncadd [#allocation3], 4294966272 }
 0x451   :  { %991 = vsyncpa [#allocation3], 1 }

</bundles_post_ra>
